<compile_context>
chip_gen: v5e
topology: v5e:2x2
jax: 0.10.0
libtpu: 0.0.40
codegen_flags: <defaults>
</compile_context>

<pallas_src>
import functools

import jax
import jax.numpy as jnp
from jax import lax
from jax.experimental import pallas as pl
from jax.experimental.pallas import tpu as pltpu


# --------------------------------- kernel -----------------------------------

def rotary_kernel(scale_ref, offs_ref, o_ref, *, block_rows):
    # scale_ref / offs_ref: (1, packed_dim) constants, resident across the grid
    # o_ref:                (block_rows, packed_dim) output tile
    packed_dim = o_ref.shape[-1]
    row0 = pl.program_id(0) * block_rows
    # packed-row index for every element of this tile, generated in vregs
    r = (lax.broadcasted_iota(jnp.int32, (block_rows, packed_dim), 0) + row0
         ).astype(jnp.float32)
    # freqs[r*k + m, j] = r * (k * inv_freq[j]) + m * inv_freq[j]
    o_ref[...] = r * scale_ref[...] + offs_ref[...]


# ------------------------------ tiling heuristic -----------------------------

def _choose_block_rows(packed_rows, packed_dim, target_bytes=4 << 20):
    """Bytes-sized sequence tiles (multiple of 8 rows), >=2 grid steps when big."""
    total_bytes = packed_rows * packed_dim * 4
    if packed_rows <= 8 or total_bytes <= (256 << 10):
        return packed_rows  # one full-array tile (exempt from the (8,128) rule)
    rows_by_bytes = max(8, (target_bytes // (4 * packed_dim)) // 8 * 8)
    # cap at ~half the rows so both v7x TensorCores get work on the parallel axis
    half_rows = max(8, (((packed_rows + 1) // 2) + 7) // 8 * 8)
    return max(8, min(rows_by_bytes, half_rows, packed_rows // 8 * 8))


# ----------------------------- pallas_call wrapper ---------------------------

def rotary_embedding(seq_len, inv_freq, *, block_rows=None, force_pallas=False,
                     small_table_bytes=64 << 10):
    """Pallas equivalent of RotaryEmbedding.forward(seq_len)."""
    half = int(inv_freq.shape[0])
    dim = 2 * half
    inv_freq = inv_freq.astype(jnp.float32)

    # Tiny-table fast path: launch overhead dwarfs ~KiB of work.
    if not force_pallas and seq_len * dim * 4 <= small_table_bytes:
        return reference_rotary(seq_len, inv_freq)

    # cat((freqs, freqs), -1) folded into the parameter once at setup time.
    inv_freq_full = jnp.concatenate([inv_freq, inv_freq])          # (dim,)

    # Lane-dense packing factor: k sequence rows per 128-lane packed row.
    if dim < 128 and 128 % dim == 0 and seq_len % (128 // dim) == 0:
        k = 128 // dim
    else:
        k = 1
    packed_dim = k * dim
    packed_rows = seq_len // k

    # Per-packed-row scale and intra-pack offset constants (tiny, setup-time).
    scale = jnp.tile(inv_freq_full * float(k), (k,)).reshape(1, packed_dim)
    offs = (jnp.repeat(jnp.arange(k, dtype=jnp.float32), dim)
            * jnp.tile(inv_freq_full, (k,))).reshape(1, packed_dim)

    if block_rows is None:
        block_rows = _choose_block_rows(packed_rows, packed_dim)
    assert block_rows == packed_rows or block_rows % 8 == 0, \
        "block_rows must be the full (packed) row count or a multiple of 8"

    grid = (pl.cdiv(packed_rows, block_rows),)
    kern = functools.partial(rotary_kernel, block_rows=block_rows)

    cost = pl.CostEstimate(
        flops=2 * seq_len * dim,
        transcendentals=0,
        bytes_accessed=seq_len * dim * 4 + 2 * packed_dim * 4,
    )

    packed = pl.pallas_call(
        kern,
        out_shape=jax.ShapeDtypeStruct((packed_rows, packed_dim), jnp.float32),
        grid=grid,
        in_specs=[pl.BlockSpec((1, packed_dim), lambda i: (0, 0)),
                  pl.BlockSpec((1, packed_dim), lambda i: (0, 0))],
        out_specs=pl.BlockSpec((block_rows, packed_dim), lambda i: (i, 0)),
        compiler_params=pltpu.CompilerParams(
            dimension_semantics=("parallel",)),
        cost_estimate=cost,
    )(scale, offs)

    # Row-major reshape back to the module's (seq_len, dim) contract (no copy).
    return packed.reshape(seq_len, dim)


# ------------------------------ pure-JAX reference ---------------------------

def reference_rotary(seq_len, inv_freq):
    t = jnp.arange(seq_len, dtype=jnp.float32)
    freqs = jnp.einsum("i,j->ij", t, inv_freq.astype(jnp.float32))
    return jnp.concatenate([freqs, freqs], axis=-1)


# ----------------------------------- main ------------------------------------

if __name__ == "__main__":
    # Deterministic setup. The module's forward takes only seq_len (and device,
    # a no-op here), so the PRNG key is defined for protocol but unused.
    key = jax.random.PRNGKey(0)
    del key

    def make_inv_freq(dim):
        return 1.0 / (10000.0 ** (jnp.arange(0, dim, 2, dtype=jnp.float32) / dim))

    def check(seq_len, dim, **kw):
        inv_freq = make_inv_freq(dim)
        out = jax.block_until_ready(
            rotary_embedding(seq_len, inv_freq, force_pallas=True, **kw))
        ref = reference_rotary(seq_len, inv_freq)
        assert out.shape == ref.shape == (seq_len, dim), (out.shape, ref.shape)
        assert jnp.allclose(out, ref, atol=1e-5, rtol=1e-6), \
            float(jnp.max(jnp.abs(out - ref)))

    # Small shapes consistent with the module: seq_len=8, dim=32
    # (lane-packed k=4 -> output view is (2, 128), single tile).
    check(seq_len=8, dim=32)

    # Larger case: k=2 packing, bytes-sized tiles, multi-step grid
    # (packed view (2048, 128) -> two 1024-row tiles on the parallel axis).
    check(seq_len=4096, dim=64)

    # Unpacked path (dim == 128, already lane-dense).
    check(seq_len=256, dim=128)

    print("KERNEL_OK")
</pallas_src>

<mosaic_0001>
module attributes {stable_mosaic.version = 11 : i64} {
  func.func @rotary_kernel(%arg0: i32, %arg1: memref<1x128xf32, #tpu.memory_space<vmem>>, %arg2: memref<1x128xf32, #tpu.memory_space<vmem>>, %arg3: memref<2x128xf32, #tpu.memory_space<vmem>>) attributes {dimension_semantics = [#tpu.dimension_semantics<parallel>], iteration_bounds = array<i64: 1>, scalar_prefetch = 0 : i64, scratch_operands = 0 : i64, tpu.core_type = #tpu.core_type<tc>, window_params = [{pipeline_mode = #tpu.pipeline_mode<synchronous>, transform_indices = @transform_0, window_bounds = array<i64: 1, 128>}, {pipeline_mode = #tpu.pipeline_mode<synchronous>, transform_indices = @transform_1, window_bounds = array<i64: 1, 128>}, {transform_indices = @transform_2, window_bounds = array<i64: 2, 128>}]} {
    %c2_i32 = arith.constant 2 : i32
    %0 = arith.muli %arg0, %c2_i32 : i32
    %1 = tpu.iota {dimensions = array<i32: 0>} : vector<2x128xi32>
    %2 = vector.broadcast %0 : i32 to vector<2x128xi32>
    %3 = arith.addi %1, %2 : vector<2x128xi32>
    %4 = arith.sitofp %3 : vector<2x128xi32> to vector<2x128xf32>
    %c0 = arith.constant 0 : index
    %c0_0 = arith.constant 0 : index
    %5 = vector.load %arg1[%c0, %c0_0] : memref<1x128xf32, #tpu.memory_space<vmem>>, vector<1x128xf32>
    %6 = vector.broadcast %5 : vector<1x128xf32> to vector<2x128xf32>
    %7 = arith.mulf %4, %6 : vector<2x128xf32>
    %c0_1 = arith.constant 0 : index
    %c0_2 = arith.constant 0 : index
    %8 = vector.load %arg2[%c0_1, %c0_2] : memref<1x128xf32, #tpu.memory_space<vmem>>, vector<1x128xf32>
    %9 = vector.broadcast %8 : vector<1x128xf32> to vector<2x128xf32>
    %10 = arith.addf %7, %9 : vector<2x128xf32>
    %c0_3 = arith.constant 0 : index
    %c0_4 = arith.constant 0 : index
    %11 = vector.load %arg3[%c0_3, %c0_4] : memref<2x128xf32, #tpu.memory_space<vmem>>, vector<2x128xf32>
    tpu.vector_store %arg3[%c0_3, %c0_4], %10 {strides = array<i32>} : memref<2x128xf32, #tpu.memory_space<vmem>>, vector<2x128xf32>,
    return
  }
  func.func @transform_0(%arg0: i32) -> (i32, i32) {
    %c0_i32 = arith.constant 0 : i32
    %c0_i32_0 = arith.constant 0 : i32
    %c0_i32_1 = arith.constant 0 : i32
    return %c0_i32, %c0_i32_0 : i32, i32
  }
  func.func @transform_1(%arg0: i32) -> (i32, i32) {
    %c0_i32 = arith.constant 0 : i32
    %c0_i32_0 = arith.constant 0 : i32
    %c0_i32_1 = arith.constant 0 : i32
    return %c0_i32, %c0_i32_0 : i32, i32
  }
  func.func @transform_2(%arg0: i32) -> (i32, i32) {
    %c0_i32 = arith.constant 0 : i32
    %c0_i32_0 = arith.constant 0 : i32
    return %arg0, %c0_i32 : i32, i32
  }
}

</mosaic_0001>

<bundles_post_ra>
// kernel: tpu_custom_call.1
= control target key start
LH: loop header
LB: loop body
LE: loop exit
PB: predicated region body
PF: predicated region fallthrough
CT: control target
= control target key end

     0   :  { %7 = vsyncpa [#allocation3], 0  ;;  %s185_s0 = inlined_call_operand.hbm [shape: f32[1,128], index: 0, kind: input, shape index: {}]   ;;  %s186_s1 = inlined_call_operand.hbm [shape: f32[1,128], index: 1, kind: input, shape index: {}]   ;;  %s187_s2 = inlined_call_operand.hbm [shape: f32[2,128], index: 2, kind: output, shape index: {}]  }
   0x1   :  { %8 = vsyncpa [#allocation6], 0 }
   0x2   :  { %9 = vsyncpa [#allocation4], 0  ;;  %s15_s11 = sshll.u32 %s185_s0, 4  ;;  %s158_s12 = smov [#allocation2]   ;;  %s16_s11 = int_to_ptr.hbm [resolvable:$true] %s15_s11 }
   0x3   :  { %s17_s13 = sshll.u32 %s158_s12, 4  ;;  %s26_s16 = sshll.u32 %s186_s1, 4  ;;  %s18_s13 = int_to_ptr.vmem [resolvable:$true] %s17_s13  ;;  %s27_s16 = int_to_ptr.hbm [resolvable:$true] %s26_s16 }
   0x4   :  { %20 = dma.hbm_to_vmem [thread:$0]  %s16_s11, 16, %s18_s13, [#allocation3]  }
   0x5   :  { %s159_s17 = smov [#allocation5]  }
   0x6   :  { %s28_s18 = sshll.u32 %s159_s17, 4  ;;  %s29_s18 = int_to_ptr.vmem [resolvable:$true] %s28_s18 }
   0x7   :  { %31 = dma.hbm_to_vmem [thread:$0]  %s27_s16, 16, %s29_s18, [#allocation6]  }
   0x8   :  { %152 = dma.done.wait [#allocation3], 16  }
   0x9   :  { %153 = vsyncadd [#allocation3], 4294967280 }
   0xa   :  { %154 = dma.done.wait [#allocation6], 16  }
   0xb   :  { %155 = vsyncadd [#allocation6], 4294967280  ;;  %v41_v0 = vlaneseq  ;;  %v78_v3 = vld [vmem:[#allocation2] ss:$0 sm:$0xff]  ;;  %v79_v4 = vld [vmem:[#allocation5] ss:$0 sm:$0xff] }
   0xc   :  { %s160_s0 = smov [#allocation7]   ;;  %s64_s1 = sshll.u32 %s187_s2, 4  ;;  %s65_s1 = int_to_ptr.hbm [resolvable:$true] %s64_s1 }
   0xd   :  { %v42_v1 = vshrl.u32 %v41_v0, 7  ;;  %s62_s19 = sshll.u32 %s160_s0, 4  ;;  %s63_s19 = int_to_ptr.vmem [resolvable:$true] %s62_s19 }
   0xf   :  { %v45_v2 = vcvt.s32.f32 %v42_v1 }
  0x11   :  { %v50_v5 = vmul.f32 %v78_v3, %v45_v2 }
  0x13   :  { %v55_v6 = vadd.f32 %v79_v4, %v50_v5 }
  0x15   :  { %56 = vst [vmem:[#allocation7] sm:$0x3] %v55_v6 }
  0x16   :  { %67 = dma.vmem_to_hbm [thread:$0]  %s63_s19, 32, %s65_s1, [#allocation4]  }
  0x17   :  { %156 = dma.done.wait [#allocation4], 32  }
  0x18   :  { %157 = vsyncadd [#allocation4], 4294967264 }
  0x19   :  { %72 = vsyncpa [#allocation3], 1 }
  0x1a   :  { %73 = vsyncpa [#allocation6], 1 }
  0x1b   :  { %74 = vsyncpa [#allocation4], 1 }

</bundles_post_ra>
